<compile_context>
chip_gen: v7x
topology: tpu7x:2x2x1
jax: 0.10.0
libtpu: 0.0.40
codegen_flags: <defaults>
</compile_context>

<pallas_src>
import math
import functools

import jax
import jax.numpy as jnp
from jax.experimental import pallas as pl
from jax.experimental.pallas import tpu as pltpu


# ---------------------------------------------------------------------------
# Kernel helpers
# ---------------------------------------------------------------------------

def _add_pe(x, pe, *, batch, flat):
    """x + pe with pe broadcast across the batch axis.

    3-D path (flat=False): x is (ts, B, D), pe is (ts, 1, D); `+` broadcasts
    over the sublane (batch) axis -- near free.
    2-D path (flat=True, only when D < 128): x is (ts, B*D), pe is (ts, D);
    replicate pe along lanes (D is small, so the concat is cheap).
    """
    if flat and batch > 1:
        pe = jnp.concatenate([pe] * batch, axis=-1)
    return x + pe


def _keep_mask_bits(seed_ref, shape, *, hw_prng):
    """Uniform uint32 bits of `shape` for the dropout keep decision."""
    if hw_prng:
        # Hardware PRNG: independent stream per (seed, tile); raw 32-bit draws.
        pltpu.prng_seed(seed_ref[0], pl.program_id(0))
        return pltpu.bitcast(pltpu.prng_random_bits(shape), jnp.uint32)
    # Fallback (non-TPU backends): counter-based fmix32-style hash with plain
    # uint32 VPU ops.  Not a vetted PRNG, but adequate for dropout.
    idx = jax.lax.broadcasted_iota(jnp.uint32, shape, 0)
    idx = idx + pl.program_id(0).astype(jnp.uint32) * jnp.uint32(shape[0])
    for ax in range(1, len(shape)):
        idx = idx * jnp.uint32(shape[ax]) + jax.lax.broadcasted_iota(jnp.uint32, shape, ax)
    h = idx ^ (seed_ref[0].astype(jnp.uint32) * jnp.uint32(0x9E3779B1))
    h = h * jnp.uint32(0x85EBCA6B)
    h = h ^ (h >> jnp.uint32(13))
    h = h * jnp.uint32(0xC2B2AE35)
    h = h ^ (h >> jnp.uint32(16))
    return h


# ---------------------------------------------------------------------------
# Kernels
# ---------------------------------------------------------------------------

def _pe_add_kernel(x_ref, pe_ref, o_ref, *, batch, flat):
    # Eval path: y = x + pe (broadcast over batch), native dtype.
    o_ref[...] = _add_pe(x_ref[...], pe_ref[...], batch=batch, flat=flat)


def _pe_add_dropout_kernel(seed_ref, x_ref, pe_ref, o_ref, *,
                           batch, flat, p_dropout, hw_prng):
    # Training path: y = dropout(x + pe), inverted dropout.
    y = _add_pe(x_ref[...], pe_ref[...], batch=batch, flat=flat)
    bits = _keep_mask_bits(seed_ref, y.shape, hw_prng=hw_prng)
    # Integer-domain keep decision: exact probability, no u32->f32 casts.
    threshold = jnp.uint32(min(int(round(p_dropout * 4294967296.0)), 0xFFFFFFFF))
    keep = bits >= threshold
    # Note: for bf16 inputs the 1/(1-p) factor rounds into bf16 (matches
    # PyTorch-in-bf16 behaviour).
    scale = 1.0 / (1.0 - p_dropout)
    o_ref[...] = jnp.where(keep, y * scale, jnp.zeros_like(y))


# ---------------------------------------------------------------------------
# Wrapper
# ---------------------------------------------------------------------------

def _choose_seq_tile(S, row_bytes):
    """Sequence-tile size: ~4 MiB x blocks, multiple of 8, >= 2 grid steps
    (double buffering), prefer an even step count (v7x: two TensorCores
    split the parallel axis).  Full extent for tiny inputs."""
    total = S * row_bytes
    if S <= 16 or total <= (512 << 10):
        return S
    target = 4 << 20                              # ~4 MiB of x per block
    ts = min(S, max(8, target // max(row_bytes, 1)))
    ts = min(ts, (S + 1) // 2)                    # at least 2 grid steps
    ts = max(8, ts - (ts % 8))                    # (8, 128) sublane rule
    steps = -(-S // ts)
    if steps > 2 and steps % 2 == 1:              # nudge to an even step count
        ts2 = -(-S // (steps + 1))
        ts2 = max(8, ((ts2 + 7) // 8) * 8)
        if (-(-S // ts2)) % 2 == 0:
            ts = ts2
    return ts


class PositionalEncoding:
    def __init__(self, d_model, dropout=0.1, max_len=5000):
        assert 0.0 <= dropout < 1.0, "dropout probability must be in [0, 1)"
        self.d_model = d_model
        self.p = float(dropout)
        self.max_len = max_len
        position = jnp.arange(max_len, dtype=jnp.float32)[:, None]          # (L, 1)
        div_term = jnp.exp(
            jnp.arange(0, d_model, 2, dtype=jnp.float32)
            * (-math.log(10000.0) / d_model)
        )                                                                    # (D/2,)
        pe = jnp.zeros((max_len, d_model), dtype=jnp.float32)
        pe = pe.at[:, 0::2].set(jnp.sin(position * div_term))
        pe = pe.at[:, 1::2].set(jnp.cos(position * div_term))
        self.pe = pe                                                         # (L, D)
        self._pe_cache = {}                                                  # per (dtype, layout)

    def _pe_for(self, dtype, flat):
        key = (jnp.dtype(dtype).name, bool(flat))
        pe = self._pe_cache.get(key)
        if pe is None:
            pe = self.pe.astype(dtype)
            if not flat:
                pe = pe.reshape(self.max_len, 1, self.d_model)
            self._pe_cache[key] = pe
        return pe

    def __call__(self, x, *, training=False, seed=0):
        # x: (S, B, D), sequence-first like the PyTorch module.
        S, B, D = x.shape
        assert D == self.d_model and S <= self.max_len
        dtype = x.dtype

        flat = D < 128                             # lane-dense 2D only for small D
        pe_full = self._pe_for(dtype, flat)        # cached, full table

        row_bytes = B * D * jnp.dtype(dtype).itemsize
        ts = _choose_seq_tile(S, row_bytes)
        grid = (pl.cdiv(S, ts),)

        if flat:
            x_in = x.reshape(S, B * D)             # free contiguous reshape
            x_block = (ts, B * D)
            pe_block = (ts, D)
            out_shape = jax.ShapeDtypeStruct((S, B * D), dtype)
        else:
            x_in = x
            x_block = (ts, B, D)
            pe_block = (ts, 1, D)
            out_shape = jax.ShapeDtypeStruct((S, B, D), dtype)

        trail = (0,) * (len(x_block) - 1)
        cparams = pltpu.CompilerParams(
            dimension_semantics=("parallel",),     # independent seq tiles (v7x 2-TC)
            vmem_limit_bytes=32 * 1024 * 1024,     # safe on v5e/v6e/v7x
        )

        if training and self.p > 0.0:
            hw_prng = jax.devices()[0].platform == "tpu"
            kernel = functools.partial(
                _pe_add_dropout_kernel, batch=B, flat=flat,
                p_dropout=self.p, hw_prng=hw_prng,
            )
            seed_arr = jnp.asarray([seed], dtype=jnp.int32)
            out = pl.pallas_call(
                kernel,
                out_shape=out_shape,
                grid_spec=pltpu.PrefetchScalarGridSpec(
                    num_scalar_prefetch=1,
                    grid=grid,
                    in_specs=[
                        pl.BlockSpec(x_block, lambda i, s: (i,) + trail),
                        pl.BlockSpec(pe_block, lambda i, s: (i,) + trail),
                    ],
                    out_specs=pl.BlockSpec(x_block, lambda i, s: (i,) + trail),
                ),
                compiler_params=cparams,
            )(seed_arr, x_in, pe_full)
        else:
            # Inference path: no seed plumbing, plain GridSpec.
            kernel = functools.partial(_pe_add_kernel, batch=B, flat=flat)
            out = pl.pallas_call(
                kernel,
                out_shape=out_shape,
                grid_spec=pl.GridSpec(
                    grid=grid,
                    in_specs=[
                        pl.BlockSpec(x_block, lambda i: (i,) + trail),
                        pl.BlockSpec(pe_block, lambda i: (i,) + trail),
                    ],
                    out_specs=pl.BlockSpec(x_block, lambda i: (i,) + trail),
                ),
                compiler_params=cparams,
            )(x_in, pe_full)

        return out.reshape(S, B, D)


if __name__ == "__main__":
    key = jax.random.PRNGKey(0)

    # ---- small-D path (D < 128 -> lane-dense 2D layout) ---------------------
    S, B, D = 8, 2, 32
    x = jax.random.normal(key, (S, B, D), dtype=jnp.float32)
    mod = PositionalEncoding(d_model=D, dropout=0.1, max_len=64)

    out = jax.block_until_ready(mod(x, training=False))
    ref = x + mod.pe[:S][:, None, :]
    assert out.shape == (S, B, D)
    assert jnp.allclose(out, ref, atol=1e-6), "mismatch vs reference (eval, small D)"

    out_train = jax.block_until_ready(mod(x, training=True, seed=123))
    scaled = ref / (1.0 - mod.p)
    ok = jnp.logical_or(
        jnp.isclose(out_train, 0.0, atol=1e-6),
        jnp.isclose(out_train, scaled, atol=1e-5, rtol=1e-5),
    )
    assert bool(jnp.all(ok)), "training output not in {0, (x+pe)/(1-p)} (small D)"

    # ---- wide-D path (D % 128 == 0 -> 3D blocks, sublane-broadcast pe) ------
    S2, B2, D2 = 16, 2, 128
    x2 = jax.random.normal(jax.random.PRNGKey(1), (S2, B2, D2), dtype=jnp.float32)
    mod2 = PositionalEncoding(d_model=D2, dropout=0.1, max_len=64)

    out2 = jax.block_until_ready(mod2(x2, training=False))
    ref2 = x2 + mod2.pe[:S2][:, None, :]
    assert jnp.allclose(out2, ref2, atol=1e-6), "mismatch vs reference (eval, wide D)"

    out2_train = jax.block_until_ready(mod2(x2, training=True, seed=7))
    scaled2 = ref2 / (1.0 - mod2.p)
    ok2 = jnp.logical_or(
        jnp.isclose(out2_train, 0.0, atol=1e-6),
        jnp.isclose(out2_train, scaled2, atol=1e-5, rtol=1e-5),
    )
    assert bool(jnp.all(ok2)), "training output not in {0, (x+pe)/(1-p)} (wide D)"

    print("KERNEL_OK")
</pallas_src>

<mosaic_0001>
module attributes {stable_mosaic.version = 11 : i64} {
  func.func @_pe_add_kernel(%arg0: i32, %arg1: memref<8x64xf32, #tpu.memory_space<vmem>>, %arg2: memref<8x32xf32, #tpu.memory_space<vmem>>, %arg3: memref<8x64xf32, #tpu.memory_space<vmem>>) attributes {dimension_semantics = [#tpu.dimension_semantics<parallel>], iteration_bounds = array<i64: 1>, scalar_prefetch = 0 : i64, scratch_operands = 0 : i64, tpu.core_type = #tpu.core_type<tc>, window_params = [{transform_indices = @transform_0, window_bounds = array<i64: 8, 64>}, {transform_indices = @transform_1, window_bounds = array<i64: 8, 32>}, {transform_indices = @transform_2, window_bounds = array<i64: 8, 64>}]} {
    %c0 = arith.constant 0 : index
    %c0_0 = arith.constant 0 : index
    %0 = vector.load %arg1[%c0, %c0_0] : memref<8x64xf32, #tpu.memory_space<vmem>>, vector<8x64xf32>
    %c0_1 = arith.constant 0 : index
    %c0_2 = arith.constant 0 : index
    %1 = vector.load %arg2[%c0_1, %c0_2] : memref<8x32xf32, #tpu.memory_space<vmem>>, vector<8x32xf32>
    %2 = tpu.concatenate %1, %1 in 1 : vector<8x32xf32>, vector<8x32xf32> -> vector<8x64xf32>
    %3 = arith.addf %0, %2 : vector<8x64xf32>
    %c0_3 = arith.constant 0 : index
    %c0_4 = arith.constant 0 : index
    %4 = vector.load %arg3[%c0_3, %c0_4] : memref<8x64xf32, #tpu.memory_space<vmem>>, vector<8x64xf32>
    tpu.vector_store %arg3[%c0_3, %c0_4], %3 {strides = array<i32>} : memref<8x64xf32, #tpu.memory_space<vmem>>, vector<8x64xf32>,
    return
  }
  func.func @transform_0(%arg0: i32) -> (i32, i32) {
    %c0_i32 = arith.constant 0 : i32
    %c0_i32_0 = arith.constant 0 : i32
    return %arg0, %c0_i32 : i32, i32
  }
  func.func @transform_1(%arg0: i32) -> (i32, i32) {
    %c0_i32 = arith.constant 0 : i32
    %c0_i32_0 = arith.constant 0 : i32
    return %arg0, %c0_i32 : i32, i32
  }
  func.func @transform_2(%arg0: i32) -> (i32, i32) {
    %c0_i32 = arith.constant 0 : i32
    %c0_i32_0 = arith.constant 0 : i32
    return %arg0, %c0_i32 : i32, i32
  }
}

</mosaic_0001>

<bundles_post_ra>
// kernel: tpu_custom_call.1
= control target key start
LH: loop header
LB: loop body
LE: loop exit
PB: predicated region body
PF: predicated region fallthrough
CT: control target
= control target key end

     0   :  { %s98_s0 = inlined_call_operand.vmem [shape: f32[8,64], index: 0, kind: input, shape index: {}]   ;;  %s99_s1 = inlined_call_operand.vmem [shape: f32[64,32], index: 1, kind: input, shape index: {}]   ;;  %s100_s2 = inlined_call_operand.hbm [shape: f32[8,64], index: 2, kind: output, shape index: {}]  }
   0x1   :  { %v13_v0 = vld [vmem:[%s99_s1] sm:$0xff] }
   0x2   :  { %7 = vsyncpa [#allocation3], 0  ;;  %s63_s11 = smov 32   ;;  %vm18_vm0 = vcmask 261120   ;;  %v12_v1 = vld [vmem:[%s98_s0] sm:$0xff]  ;;  %s64_s14 = smov [#allocation2]  }
   0x3   :  { %15 = vrot.lane.b32.xlu0 %v13_v0, %s63_s11  ;;  %s29_s15 = sshll.u32 %s64_s14, 4  ;;  %vm21_vm1 = vcmask 523264   ;;  %s30_s15 = int_to_ptr.vmem [resolvable:$true] %s29_s15 }
   0x4   :  { %s39_s16 = scalar_lea.vmem %s30_s15, 128  ;;  %p44_p1 = scmp.lt.s32.totalorder %s30_s15, %s30_s15 }
   0x5   :  { %p40_p0 = scmp.ne.s32.totalorder %s30_s15, %s39_s16  ;;  %p45_p2 = scmp.lt.s32.totalorder %s39_s16, %s39_s16 }
   0x7   :  { %p46_p3 = por %p45_p2, %p44_p1 }
   0x9   :  { %p47_p4 = pnand %p46_p3, %p40_p0 }
  0x75   :  { %v16_v2 = vpop.permute.xlu0 %15 }
  0x76   :  { %v19_v3 = vsel %vm18_vm0, %v13_v0, %v16_v2 }
  0x77   :  { %v20_v4 = vadd.f32 %v19_v3, %v12_v1 }
  0x79   :  { %22 = vst.msk [vmem:[#allocation2] sm:$0xff] %vm21_vm1, %v20_v4 }
  0x7a   :  { %50 = shalt.err (!%p47_p4)
}
  0x7b   :  { %s51_s18 = scalar_lea.hbm %s100_s2, 128 }
  0x7c   :  { %p52_p5 = scmp.ne.s32.totalorder %s100_s2, %s51_s18  ;;  %p55_p6 = scmp.lt.u32.totalorder %s51_s18, %s100_s2 }
  0x7e   :  { %p57_p7 = pnand %p55_p6, %p52_p5 }
  0x80   :  { %60 = shalt.err (!%p57_p7)
}
  0x81   :  { %32 = dma.vmem_to_hbm [thread:$0]  %s30_s15, 128, %s100_s2, [#allocation3]  }
  0x82   :  { %61 = dma.done.wait [#allocation3], 128  }
  0x83   :  { %62 = vsyncadd [#allocation3], 4294967168 }
  0x84   :  { %36 = vsyncpa [#allocation3], 1 }

</bundles_post_ra>
